<compile_context>
chip_gen: v6e
topology: v6e:2x2x1
jax: 0.10.0
libtpu: 0.0.40
codegen_flags: <defaults>
</compile_context>

<pallas_src>
import functools

import jax
import jax.numpy as jnp
from jax.experimental import pallas as pl
from jax.experimental.pallas import tpu as pltpu


def _round_up(n: int, m: int) -> int:
    return ((n + m - 1) // m) * m


def _lane_multiple(n: int) -> int:
    # v6e/v7x MXUs are 256 wide: use 256-alignment for large dims so K/N don't
    # run the systolic array half-empty; 128 keeps small dims compact.
    return 256 if n >= 512 else 128


def _vmem_budget_bytes() -> int:
    # ~75% of physical per-core VMEM, capped at 100 MiB:
    #   v5e/v6e (128 MiB) -> 96 MiB, v7x (64 MiB/TC) -> 48 MiB.
    try:
        cap = int(pltpu.get_tpu_info().vmem_capacity_bytes)
    except Exception:
        cap = 64 * 1024 * 1024  # conservative (v7x-safe) fallback
    return min(cap * 3 // 4, 100 * 1024 * 1024)


def _choose_tb(batch, ip, op, resident_bytes, budget_bytes,
               x_itemsize, out_itemsize, tb_request):
    """Largest batch tile that fits the VMEM budget; prefer divisors of B."""
    b8 = _round_up(batch, 8)
    tb = max(8, min(_round_up(tb_request, 8), b8))

    def fits(t):
        streamed = 2 * t * ip * x_itemsize + 2 * t * op * out_itemsize
        return resident_bytes + streamed <= int(budget_bytes * 0.85)

    while tb > 8 and not fits(tb):
        tb = max(8, _round_up(tb // 2, 8))

    # Snap to a divisor of the 8-aligned batch so no full-tensor pad/slice
    # HBM round trip is needed when B is large.
    if b8 % tb != 0:
        d = tb
        while d > 8 and b8 % d != 0:
            d -= 8
        if b8 % d == 0 and d >= max(8, tb // 2):
            tb = d
    return tb


def _mlp_kernel(x_ref, w1_ref, b1_ref, w2_ref, b2_ref, o_ref):
    # fc1: x @ W1 (low-precision multiply on the MXU, f32 accumulate) + b1, ReLU
    h = jnp.dot(x_ref[...], w1_ref[...], preferred_element_type=jnp.float32)
    h = jnp.maximum(h + b1_ref[...], 0.0)          # (TB, Hp) + (1, Hp) on the VPU
    # out: relu(h) @ W2 + b2
    y = jnp.dot(h.astype(w2_ref.dtype), w2_ref[...],
                preferred_element_type=jnp.float32)
    o_ref[...] = (y + b2_ref[...]).astype(o_ref.dtype)


def _build_specs(TB, Ip, Hp, Op, single_buffer_weights):
    wkw = {"pipeline_mode": pl.Buffered(1)} if single_buffer_weights else {}
    in_specs = [
        pl.BlockSpec((TB, Ip), lambda i: (i, 0)),          # x: streamed per batch tile
        pl.BlockSpec((Ip, Hp), lambda i: (0, 0), **wkw),   # weights/biases: VMEM-resident
        pl.BlockSpec((1, Hp), lambda i: (0, 0), **wkw),
        pl.BlockSpec((Hp, Op), lambda i: (0, 0), **wkw),
        pl.BlockSpec((1, Op), lambda i: (0, 0), **wkw),
    ]
    out_spec = pl.BlockSpec((TB, Op), lambda i: (i, 0))
    return in_specs, out_spec


def prepare_params(w1, b1, w2, b2, *, weight_dtype=jnp.bfloat16):
    """Pad + cast the weights ONCE, outside the per-call path.

    w1: (I, H), w2: (H, O)  (i.e. transposed vs. PyTorch's (out, in) layout).
    b1 / b2 may be 1-D (PyTorch convention) or (1, N).
    """
    w1 = jnp.asarray(w1)
    w2 = jnp.asarray(w2)
    b1 = jnp.asarray(b1).reshape(1, -1)
    b2 = jnp.asarray(b2).reshape(1, -1)

    I, H = w1.shape
    H2, O = w2.shape
    assert H == H2 and b1.shape[1] == H and b2.shape[1] == O

    Ip = _round_up(I, _lane_multiple(I))
    Hp = _round_up(H, _lane_multiple(H))
    Op = _round_up(O, _lane_multiple(O))

    return {
        "w1": jnp.pad(w1, ((0, Ip - I), (0, Hp - H))).astype(weight_dtype),
        "b1": jnp.pad(b1, ((0, 0), (0, Hp - H))).astype(jnp.float32),
        "w2": jnp.pad(w2, ((0, Hp - H), (0, Op - O))).astype(weight_dtype),
        "b2": jnp.pad(b2, ((0, 0), (0, Op - O))).astype(jnp.float32),
        "out_size": O,
    }


@functools.partial(
    jax.jit,
    static_argnames=("out_size", "tb", "out_dtype", "single_buffer_weights"))
def _forward_impl(x, w1_p, b1_p, w2_p, b2_p, *, out_size, tb, out_dtype,
                  single_buffer_weights):
    B, I = x.shape
    Ip, Hp = w1_p.shape
    Op = w2_p.shape[1]
    out_dtype = x.dtype if out_dtype is None else out_dtype

    w_item = jnp.dtype(w1_p.dtype).itemsize
    out_item = jnp.dtype(out_dtype).itemsize
    wbuf = 1 if single_buffer_weights else 2
    resident = wbuf * ((Ip * Hp + Hp * Op) * w_item + (Hp + Op) * 4)

    budget = _vmem_budget_bytes()
    TB = _choose_tb(B, Ip, Op, resident, budget, w_item, out_item, tb)
    Bp = _round_up(B, TB)

    # x is the only per-step streamed operand: cast it to the weight dtype
    # (bf16 by default) fused with the pad -> half the HBM bytes and half the
    # VMEM double-buffer per step.  Accumulation stays f32 on the MXU.
    x_p = jnp.pad(x, ((0, Bp - B), (0, Ip - I))).astype(w1_p.dtype)

    in_specs, out_spec = _build_specs(TB, Ip, Hp, Op, single_buffer_weights)

    flops = 2 * Bp * (Ip * Hp + Hp * Op)
    bytes_accessed = (Bp * Ip * w_item                       # x stream
                      + (Ip * Hp + Hp * Op) * w_item         # weights (once)
                      + (Hp + Op) * 4                        # biases
                      + Bp * Op * out_item)                  # output writeback

    out_p = pl.pallas_call(
        _mlp_kernel,
        out_shape=jax.ShapeDtypeStruct((Bp, Op), out_dtype),
        grid_spec=pltpu.PrefetchScalarGridSpec(
            num_scalar_prefetch=0,
            grid=(Bp // TB,),
            in_specs=in_specs,
            out_specs=out_spec,
        ),
        compiler_params=pltpu.CompilerParams(
            dimension_semantics=("parallel",),
            vmem_limit_bytes=budget,
        ),
        cost_estimate=pl.CostEstimate(
            flops=flops, transcendentals=0, bytes_accessed=bytes_accessed),
    )(x_p, w1_p, b1_p, w2_p, b2_p)

    return out_p[:B, :out_size]


def nn_forward(x, params, *, tb=512, out_dtype=None):
    """out = relu(x @ W1 + b1) @ W2 + b2 via a single fused Pallas kernel."""
    args = (x, params["w1"], params["b1"], params["w2"], params["b2"])
    kwargs = dict(out_size=params["out_size"], tb=tb, out_dtype=out_dtype)
    try:
        return _forward_impl(*args, single_buffer_weights=True, **kwargs)
    except Exception:
        # pipeline_mode=pl.Buffered(1) not supported by this jax/libtpu combo:
        # fall back to default (double-buffered, still VMEM-resident) weights.
        return _forward_impl(*args, single_buffer_weights=False, **kwargs)


if __name__ == "__main__":
    # Small shapes consistent with the module's forward: x is (batch, input_size)
    batch, input_size, hidden_size, output_size = 8, 32, 64, 16

    key = jax.random.PRNGKey(0)
    kx, k1, k2, k3, k4 = jax.random.split(key, 5)

    # nn.Linear-style init: U(-1/sqrt(fan_in), 1/sqrt(fan_in)); 1-D biases as in PyTorch.
    bound1 = 1.0 / (input_size ** 0.5)
    bound2 = 1.0 / (hidden_size ** 0.5)
    x = jax.random.normal(kx, (batch, input_size), jnp.float32)
    w1 = jax.random.uniform(k1, (input_size, hidden_size), jnp.float32, -bound1, bound1)
    b1 = jax.random.uniform(k2, (hidden_size,), jnp.float32, -bound1, bound1)
    w2 = jax.random.uniform(k3, (hidden_size, output_size), jnp.float32, -bound2, bound2)
    b2 = jax.random.uniform(k4, (output_size,), jnp.float32, -bound2, bound2)

    params = prepare_params(w1, b1, w2, b2)          # pad + bf16 cast, once
    out = jax.block_until_ready(nn_forward(x, params))
    assert out.shape == (batch, output_size)

    # Reference 1: emulate the kernel's bf16-multiply / f32-accumulate numerics.
    f32 = jnp.float32
    xb = x.astype(jnp.bfloat16).astype(f32)
    w1b = w1.astype(jnp.bfloat16).astype(f32)
    w2b = w2.astype(jnp.bfloat16).astype(f32)
    h_ref = jnp.maximum(jnp.dot(xb, w1b, precision="highest") + b1[None, :], 0.0)
    h_ref = h_ref.astype(jnp.bfloat16).astype(f32)
    ref_bf16 = jnp.dot(h_ref, w2b, precision="highest") + b2[None, :]
    assert jnp.allclose(out, ref_bf16, atol=1e-3, rtol=1e-3)

    # Reference 2: pure f32 semantics of the PyTorch module (loose tolerance
    # because the kernel uses bf16 weights/activations on the MXU).
    ref_f32 = jnp.maximum(x @ w1 + b1[None, :], 0.0) @ w2 + b2[None, :]
    assert jnp.allclose(out, ref_f32, atol=2e-2, rtol=2e-2)

    print("KERNEL_OK")
</pallas_src>

<mosaic_0001>
module attributes {stable_mosaic.version = 11 : i64} {
  func.func @_mlp_kernel(%arg0: i32, %arg1: memref<8x128xbf16, #tpu.memory_space<vmem>>, %arg2: memref<128x128xbf16, #tpu.memory_space<vmem>>, %arg3: memref<1x128xf32, #tpu.memory_space<vmem>>, %arg4: memref<128x128xbf16, #tpu.memory_space<vmem>>, %arg5: memref<1x128xf32, #tpu.memory_space<vmem>>, %arg6: memref<8x128xf32, #tpu.memory_space<vmem>>) attributes {dimension_semantics = [#tpu.dimension_semantics<parallel>], iteration_bounds = array<i64: 1>, scalar_prefetch = 0 : i64, scratch_operands = 0 : i64, tpu.core_type = #tpu.core_type<tc>, window_params = [{transform_indices = @transform_0, window_bounds = array<i64: 8, 128>}, {pipeline_mode = #tpu.pipeline_mode<synchronous>, transform_indices = @transform_1, window_bounds = array<i64: 128, 128>}, {pipeline_mode = #tpu.pipeline_mode<synchronous>, transform_indices = @transform_2, window_bounds = array<i64: 1, 128>}, {pipeline_mode = #tpu.pipeline_mode<synchronous>, transform_indices = @transform_3, window_bounds = array<i64: 128, 128>}, {pipeline_mode = #tpu.pipeline_mode<synchronous>, transform_indices = @transform_4, window_bounds = array<i64: 1, 128>}, {transform_indices = @transform_5, window_bounds = array<i64: 8, 128>}]} {
    %c0 = arith.constant 0 : index
    %c0_0 = arith.constant 0 : index
    %0 = vector.load %arg1[%c0, %c0_0] : memref<8x128xbf16, #tpu.memory_space<vmem>>, vector<8x128xbf16>
    %c0_1 = arith.constant 0 : index
    %c0_2 = arith.constant 0 : index
    %1 = vector.load %arg2[%c0_1, %c0_2] : memref<128x128xbf16, #tpu.memory_space<vmem>>, vector<128x128xbf16>
    %cst = arith.constant dense<0.000000e+00> : vector<8x128xf32>
    %2 = tpu.matmul %0, %1, %cst {dimension_numbers = #tpu.dot_dimension_numbers<[1], [0], [0], [1], [0, 0, 1, 1], [], []>} : vector<8x128xbf16>, vector<128x128xbf16>, vector<8x128xf32> -> vector<8x128xf32>
    %c0_3 = arith.constant 0 : index
    %c0_4 = arith.constant 0 : index
    %3 = vector.load %arg3[%c0_3, %c0_4] : memref<1x128xf32, #tpu.memory_space<vmem>>, vector<1x128xf32>
    %4 = vector.broadcast %3 : vector<1x128xf32> to vector<8x128xf32>
    %5 = arith.addf %2, %4 : vector<8x128xf32>
    %cst_5 = arith.constant 0.000000e+00 : f32
    %6 = vector.broadcast %cst_5 : f32 to vector<8x128xf32>
    %7 = arith.maximumf %5, %6 : vector<8x128xf32>
    %8 = arith.truncf %7 : vector<8x128xf32> to vector<8x128xbf16>
    %c0_6 = arith.constant 0 : index
    %c0_7 = arith.constant 0 : index
    %9 = vector.load %arg4[%c0_6, %c0_7] : memref<128x128xbf16, #tpu.memory_space<vmem>>, vector<128x128xbf16>
    %cst_8 = arith.constant dense<0.000000e+00> : vector<8x128xf32>
    %10 = tpu.matmul %8, %9, %cst_8 {dimension_numbers = #tpu.dot_dimension_numbers<[1], [0], [0], [1], [0, 0, 1, 1], [], []>} : vector<8x128xbf16>, vector<128x128xbf16>, vector<8x128xf32> -> vector<8x128xf32>
    %c0_9 = arith.constant 0 : index
    %c0_10 = arith.constant 0 : index
    %11 = vector.load %arg5[%c0_9, %c0_10] : memref<1x128xf32, #tpu.memory_space<vmem>>, vector<1x128xf32>
    %12 = vector.broadcast %11 : vector<1x128xf32> to vector<8x128xf32>
    %13 = arith.addf %10, %12 : vector<8x128xf32>
    %c0_11 = arith.constant 0 : index
    %c0_12 = arith.constant 0 : index
    %14 = vector.load %arg6[%c0_11, %c0_12] : memref<8x128xf32, #tpu.memory_space<vmem>>, vector<8x128xf32>
    tpu.vector_store %arg6[%c0_11, %c0_12], %13 {strides = array<i32>} : memref<8x128xf32, #tpu.memory_space<vmem>>, vector<8x128xf32>,
    return
  }
  func.func @transform_0(%arg0: i32) -> (i32, i32) {
    %c0_i32 = arith.constant 0 : i32
    %c0_i32_0 = arith.constant 0 : i32
    return %arg0, %c0_i32 : i32, i32
  }
  func.func @transform_1(%arg0: i32) -> (i32, i32) {
    %c0_i32 = arith.constant 0 : i32
    %c0_i32_0 = arith.constant 0 : i32
    %c0_i32_1 = arith.constant 0 : i32
    return %c0_i32, %c0_i32_0 : i32, i32
  }
  func.func @transform_2(%arg0: i32) -> (i32, i32) {
    %c0_i32 = arith.constant 0 : i32
    %c0_i32_0 = arith.constant 0 : i32
    %c0_i32_1 = arith.constant 0 : i32
    return %c0_i32, %c0_i32_0 : i32, i32
  }
  func.func @transform_3(%arg0: i32) -> (i32, i32) {
    %c0_i32 = arith.constant 0 : i32
    %c0_i32_0 = arith.constant 0 : i32
    %c0_i32_1 = arith.constant 0 : i32
    return %c0_i32, %c0_i32_0 : i32, i32
  }
  func.func @transform_4(%arg0: i32) -> (i32, i32) {
    %c0_i32 = arith.constant 0 : i32
    %c0_i32_0 = arith.constant 0 : i32
    %c0_i32_1 = arith.constant 0 : i32
    return %c0_i32, %c0_i32_0 : i32, i32
  }
  func.func @transform_5(%arg0: i32) -> (i32, i32) {
    %c0_i32 = arith.constant 0 : i32
    %c0_i32_0 = arith.constant 0 : i32
    return %arg0, %c0_i32 : i32, i32
  }
}

module attributes {stable_mosaic.version = 11 : i64} {
  func.func @_mlp_kernel(%arg0: i32, %arg1: memref<8x128xbf16, #tpu.memory_space<vmem>>, %arg2: memref<128x128xbf16, #tpu.memory_space<vmem>>, %arg3: memref<1x128xf32, #tpu.memory_space<vmem>>, %arg4: memref<128x128xbf16, #tpu.memory_space<vmem>>, %arg5: memref<1x128xf32, #tpu.memory_space<vmem>>, %arg6: memref<8x128xf32, #tpu.memory_space<vmem>>) attributes {dimension_semantics = [#tpu.dimension_semantics<parallel>], iteration_bounds = array<i64: 1>, scalar_prefetch = 0 : i64, scratch_operands = 0 : i64, tpu.core_type = #tpu.core_type<tc>, window_params = [{transform_indices = @transform_0, window_bounds = array<i64: 8, 128>}, {pipeline_mode = #tpu.pipeline_mode<synchronous>, transform_indices = @transform_1, window_bounds = array<i64: 128, 128>}, {pipeline_mode = #tpu.pipeline_mode<synchronous>, transform_indices = @transform_2, window_bounds = array<i64: 1, 128>}, {pipeline_mode = #tpu.pipeline_mode<synchronous>, transform_indices = @transform_3, window_bounds = array<i64: 128, 128>}, {pipeline_mode = #tpu.pipeline_mode<synchronous>, transform_indices = @transform_4, window_bounds = array<i64: 1, 128>}, {transform_indices = @transform_5, window_bounds = array<i64: 8, 128>}]} {
    %c0 = arith.constant 0 : index
    %c0_0 = arith.constant 0 : index
    %0 = vector.load %arg1[%c0, %c0_0] : memref<8x128xbf16, #tpu.memory_space<vmem>>, vector<8x128xbf16>
    %c0_1 = arith.constant 0 : index
    %c0_2 = arith.constant 0 : index
    %1 = vector.load %arg2[%c0_1, %c0_2] : memref<128x128xbf16, #tpu.memory_space<vmem>>, vector<128x128xbf16>
    %cst = arith.constant dense<0.000000e+00> : vector<8x128xf32>
    %2 = tpu.matmul %0, %1, %cst {dimension_numbers = #tpu.dot_dimension_numbers<[1], [0], [0], [1], [0, 0, 1, 1], [], []>} : vector<8x128xbf16>, vector<128x128xbf16>, vector<8x128xf32> -> vector<8x128xf32>
    %c0_3 = arith.constant 0 : index
    %c0_4 = arith.constant 0 : index
    %3 = vector.load %arg3[%c0_3, %c0_4] : memref<1x128xf32, #tpu.memory_space<vmem>>, vector<1x128xf32>
    %4 = vector.broadcast %3 : vector<1x128xf32> to vector<8x128xf32>
    %5 = arith.addf %2, %4 : vector<8x128xf32>
    %cst_5 = arith.constant 0.000000e+00 : f32
    %6 = vector.broadcast %cst_5 : f32 to vector<8x128xf32>
    %7 = arith.maximumf %5, %6 : vector<8x128xf32>
    %8 = arith.truncf %7 : vector<8x128xf32> to vector<8x128xbf16>
    %c0_6 = arith.constant 0 : index
    %c0_7 = arith.constant 0 : index
    %9 = vector.load %arg4[%c0_6, %c0_7] : memref<128x128xbf16, #tpu.memory_space<vmem>>, vector<128x128xbf16>
    %cst_8 = arith.constant dense<0.000000e+00> : vector<8x128xf32>
    %10 = tpu.matmul %8, %9, %cst_8 {dimension_numbers = #tpu.dot_dimension_numbers<[1], [0], [0], [1], [0, 0, 1, 1], [], []>} : vector<8x128xbf16>, vector<128x128xbf16>, vector<8x128xf32> -> vector<8x128xf32>
    %c0_9 = arith.constant 0 : index
    %c0_10 = arith.constant 0 : index
    %11 = vector.load %arg5[%c0_9, %c0_10] : memref<1x128xf32, #tpu.memory_space<vmem>>, vector<1x128xf32>
    %12 = vector.broadcast %11 : vector<1x128xf32> to vector<8x128xf32>
    %13 = arith.addf %10, %12 : vector<8x128xf32>
    %c0_11 = arith.constant 0 : index
    %c0_12 = arith.constant 0 : index
    %14 = vector.load %arg6[%c0_11, %c0_12] : memref<8x128xf32, #tpu.memory_space<vmem>>, vector<8x128xf32>
    tpu.vector_store %arg6[%c0_11, %c0_12], %13 {strides = array<i32>} : memref<8x128xf32, #tpu.memory_space<vmem>>, vector<8x128xf32>,
    return
  }
  func.func @transform_0(%arg0: i32) -> (i32, i32) {
    %c0_i32 = arith.constant 0 : i32
    %c0_i32_0 = arith.constant 0 : i32
    return %arg0, %c0_i32 : i32, i32
  }
  func.func @transform_1(%arg0: i32) -> (i32, i32) {
    %c0_i32 = arith.constant 0 : i32
    %c0_i32_0 = arith.constant 0 : i32
    %c0_i32_1 = arith.constant 0 : i32
    return %c0_i32, %c0_i32_0 : i32, i32
  }
  func.func @transform_2(%arg0: i32) -> (i32, i32) {
    %c0_i32 = arith.constant 0 : i32
    %c0_i32_0 = arith.constant 0 : i32
    %c0_i32_1 = arith.constant 0 : i32
    return %c0_i32, %c0_i32_0 : i32, i32
  }
  func.func @transform_3(%arg0: i32) -> (i32, i32) {
    %c0_i32 = arith.constant 0 : i32
    %c0_i32_0 = arith.constant 0 : i32
    %c0_i32_1 = arith.constant 0 : i32
    return %c0_i32, %c0_i32_0 : i32, i32
  }
  func.func @transform_4(%arg0: i32) -> (i32, i32) {
    %c0_i32 = arith.constant 0 : i32
    %c0_i32_0 = arith.constant 0 : i32
    %c0_i32_1 = arith.constant 0 : i32
    return %c0_i32, %c0_i32_0 : i32, i32
  }
  func.func @transform_5(%arg0: i32) -> (i32, i32) {
    %c0_i32 = arith.constant 0 : i32
    %c0_i32_0 = arith.constant 0 : i32
    return %arg0, %c0_i32 : i32, i32
  }
}

</mosaic_0001>

<bundles_post_ra>
// kernel: _forward_impl.1
= control target key start
LH: loop header
LB: loop body
LE: loop exit
PB: predicated region body
PF: predicated region fallthrough
CT: control target
= control target key end

     0   :  { %10 = vsyncpa [#allocation3], 0  ;;  %s512_s0 = inlined_call_operand.vmem [shape: bf16[8,128], index: 0, kind: input, shape index: {}]   ;;  %s513_s1 = inlined_call_operand.hbm [shape: bf16[128,128], index: 1, kind: input, shape index: {}]   ;;  %s514_s2 = inlined_call_operand.vmem [shape: f32[1,128], index: 2, kind: input, shape index: {}]   ;;  %s515_s3 = inlined_call_operand.hbm [shape: bf16[128,128], index: 3, kind: input, shape index: {}]   ;;  %s516_s4 = inlined_call_operand.vmem [shape: f32[1,128], index: 4, kind: input, shape index: {}]   ;;  %s517_s5 = inlined_call_operand.hbm [shape: f32[8,128], index: 5, kind: output, shape index: {}]  }
   0x1   :  { %11 = vsyncpa [#allocation6], 0 }
   0x2   :  { %12 = vsyncpa [#allocation4], 0  ;;  %s457_s18 = smov [#allocation2]  }
   0x3   :  { %s20_s19 = sshll.u32 %s457_s18, 4  ;;  %s21_s19 = int_to_ptr.vmem [resolvable:$true] %s20_s19 }
   0x4   :  { %s399_s20 = scalar_lea.vmem %s21_s19, 1024  ;;  %p404_p1 = scmp.lt.s32.totalorder %s21_s19, %s21_s19 }
   0x5   :  { %p400_p0 = scmp.ne.s32.totalorder %s21_s19, %s399_s20  ;;  %p405_p2 = scmp.lt.s32.totalorder %s399_s20, %s399_s20 }
   0x7   :  { %p406_p3 = por %p405_p2, %p404_p1 }
   0x9   :  { %p407_p4 = pnand %p406_p3, %p400_p0 }
   0xb   :  { %410 = shalt.err (!%p407_p4)
}
   0xc   :  { %s458_s21 = smov 64   ;;  %s459_s22 = smov 4  }
   0xd   :  { %26 = dma.hbm_to_vmem [thread:$0]  %s513_s1, 1024, %s21_s19, [#allocation3], %s458_s21, %s458_s21, %s459_s22  }
   0xe   :  { %s460_s25 = smov [#allocation5]  }
   0xf   :  { %s34_s26 = sshll.u32 %s460_s25, 4  ;;  %s35_s26 = int_to_ptr.vmem [resolvable:$true] %s34_s26 }
  0x10   :  { %s419_s27 = scalar_lea.vmem %s35_s26, 1024  ;;  %p424_p6 = scmp.lt.s32.totalorder %s35_s26, %s35_s26 }
  0x11   :  { %p420_p5 = scmp.ne.s32.totalorder %s35_s26, %s419_s27  ;;  %p425_p7 = scmp.lt.s32.totalorder %s419_s27, %s419_s27 }
  0x13   :  { %p426_p8 = por %p425_p7, %p424_p6 }
  0x15   :  { %p427_p9 = pnand %p426_p8, %p420_p5 }
  0x17   :  { %430 = shalt.err (!%p427_p9)
}
  0x18   :  { %40 = dma.hbm_to_vmem [thread:$0]  %s515_s3, 1024, %s35_s26, [#allocation6], %s458_s21, %s458_s21, %s459_s22  }
  0x19   :  { %451 = dma.done.wait [#allocation3], 1024  }
  0x1a   :  { %452 = vsyncadd [#allocation3], 4294966272 }
  0x1b   :  { %453 = dma.done.wait [#allocation6], 1024  }
  0x1c   :  { %454 = vsyncadd [#allocation6], 4294966272  ;;  %v461_v0 = vmov 0.0   ;;  %vm462_vm0 = vmmov 0   ;;  %v375_v1 = vld [vmem:[#allocation2 + $0x38] sm:$0xff]   ;;  %v376_v2 = vld [vmem:[#allocation2 + $0x30] sm:$0xff]  }
  0x1d   :  { %328 = vmatprep.subr.bf16.mxu0 %v461_v0  ;;  %344 = vmatprep.mubr.msk.bf16.mxu0 %vm462_vm0, %v461_v0  ;;  %v377_v3 = vld [vmem:[#allocation2 + $0x28] sm:$0xff]   ;;  %v383_v4 = vld [vmem:[#allocation5 + $0x38] sm:$0xff]   ;;  %v378_v5 = vld [vmem:[#allocation2 + $0x20] sm:$0xff]   ;;  %s463_s8 = smov [#allocation7]  }
  0x1e   :  { %348 = vmatprep.subr.bf16.mxu1 %v461_v0  ;;  %364 = vmatprep.mubr.msk.bf16.mxu1 %vm462_vm0, %v461_v0  ;;  %v384_v6 = vld [vmem:[#allocation5 + $0x30] sm:$0xff]   ;;  %v379_v7 = vld [vmem:[#allocation2 + $0x18] sm:$0xff]   ;;  %v385_v8 = vld [vmem:[#allocation5 + $0x28] sm:$0xff]   ;;  %s282_s9 = sshll.u32 %s463_s8, 4  ;;  %s283_s9 = int_to_ptr.vmem [resolvable:$true] %s282_s9 }
  0x1f   :  { %329 = vmatpush3.bf16.msra.mxu0 %v375_v1  ;;  %349 = vmatpush3.bf16.msra.mxu1 %v383_v4  ;;  %v380_v9 = vld [vmem:[#allocation2 + $0x10] sm:$0xff]   ;;  %v386_v10 = vld [vmem:[#allocation5 + $0x20] sm:$0xff]   ;;  %v381_v11 = vld [vmem:[#allocation2 + $0x8] sm:$0xff]   ;;  %p436_p11 = scmp.lt.s32.totalorder %s283_s9, %s283_s9 }
  0x20   :  { %330 = vmatprep.subr.bf16.mxu0 %v461_v0  ;;  %350 = vmatprep.subr.bf16.mxu1 %v461_v0  ;;  %v387_v12 = vld [vmem:[#allocation5 + $0x18] sm:$0xff]   ;;  %v382_v13 = vld [vmem:[#allocation2] sm:$0xff]   ;;  %v388_v14 = vld [vmem:[#allocation5 + $0x10] sm:$0xff]  }
  0x21   :  { %v50_v15 = vld [vmem:[%s512_s0] sm:$0xf]  ;;  %v389_v16 = vld [vmem:[#allocation5 + $0x8] sm:$0xff]  }
  0x22   :  { %v390_v17 = vld [vmem:[#allocation5] sm:$0xff]  }
  0x23   :  { %331 = vmatpush3.bf16.msra.mxu0 %v376_v2  ;;  %351 = vmatpush3.bf16.msra.mxu1 %v384_v6  ;;  %v292_v18 = vld [vmem:[%s514_s2] ss:$0 sm:$0xff]  ;;  %s431_s2 = scalar_lea.vmem %s283_s9, 128 }
  0x24   :  { %332 = vmatprep.subr.bf16.mxu0 %v461_v0  ;;  %352 = vmatprep.subr.bf16.mxu1 %v461_v0  ;;  %v301_v26 = vld [vmem:[%s516_s4] ss:$0 sm:$0xff]  ;;  %p432_p10 = scmp.ne.s32.totalorder %s283_s9, %s431_s2  ;;  %p437_p12 = scmp.lt.s32.totalorder %s431_s2, %s431_s2 }
  0x26   :  { %p438_p13 = por %p437_p12, %p436_p11 }
  0x27   :  { %333 = vmatpush3.bf16.msra.mxu0 %v377_v3  ;;  %353 = vmatpush3.bf16.msra.mxu1 %v385_v8 }
  0x28   :  { %334 = vmatprep.subr.bf16.mxu0 %v461_v0  ;;  %354 = vmatprep.subr.bf16.mxu1 %v461_v0  ;;  %p439_p0 = pnand %p438_p13, %p432_p10 }
  0x2b   :  { %335 = vmatpush3.bf16.msra.mxu0 %v378_v5  ;;  %355 = vmatpush3.bf16.msra.mxu1 %v386_v10 }
  0x2c   :  { %336 = vmatprep.subr.bf16.mxu0 %v461_v0  ;;  %356 = vmatprep.subr.bf16.mxu1 %v461_v0 }
  0x2f   :  { %337 = vmatpush3.bf16.msra.mxu0 %v379_v7  ;;  %357 = vmatpush3.bf16.msra.mxu1 %v387_v12 }
  0x30   :  { %338 = vmatprep.subr.bf16.mxu0 %v461_v0  ;;  %358 = vmatprep.subr.bf16.mxu1 %v461_v0 }
  0x33   :  { %339 = vmatpush3.bf16.msra.mxu0 %v380_v9  ;;  %359 = vmatpush3.bf16.msra.mxu1 %v388_v14 }
  0x34   :  { %340 = vmatprep.subr.bf16.mxu0 %v461_v0  ;;  %360 = vmatprep.subr.bf16.mxu1 %v461_v0 }
  0x37   :  { %341 = vmatpush3.bf16.msra.mxu0 %v381_v11  ;;  %361 = vmatpush3.bf16.msra.mxu1 %v389_v16 }
  0x38   :  { %342 = vmatprep.subr.bf16.mxu0 %v461_v0  ;;  %362 = vmatprep.subr.bf16.mxu1 %v461_v0 }
  0x3b   :  { %343 = vmatpush3.bf16.msra.mxu0 %v382_v13  ;;  %363 = vmatpush3.bf16.msra.mxu1 %v390_v17 }
  0x3e   :  { %345 = vmatmul.mubr.bf16.vlgmr.msra.gmra.mxu0 %v50_v15 }
  0xfe   :  { %v156_v19 = vpop.f32.mrf.mxu0 }
  0xff   :  { %v157_v20 = vadd.f32 %v292_v18, %v156_v19 }
 0x100   :  { %v346_v21 = vpop.f32.mrf.mxu0 }
 0x101   :  { %v162_v22 = vmax.f32 %v157_v20, 0.0 }
 0x102   :  { %v159_v23 = vpop.f32.mrf.mxu0 }
 0x103   :  { %v163_v24 = vpack.c.bf16 %v162_v22, %v162_v22 }
 0x104   :  { %v347_v25 = vpop.f32.mrf.mxu0 }
 0x105   :  { %365 = vmatmul.mubr.bf16.vlgmr.msra.gmra.mxu1 %v163_v24 }
 0x1c5   :  { %v269_v27 = vpop.f32.mrf.mxu1 }
 0x1c6   :  { %v270_v28 = vadd.f32 %v301_v26, %v269_v27 }
 0x1c7   :  { %v366_v29 = vpop.f32.mrf.mxu1 }
 0x1c8   :  { %275 = vst [vmem:[#allocation7] sm:$0xff] %v270_v28 }
 0x1c9   :  { %v272_v30 = vpop.f32.mrf.mxu1 }
 0x1ca   :  { %442 = shalt.err (!%p439_p0)
}
 0x1cb   :  { %285 = dma.vmem_to_hbm [thread:$0]  %s283_s9, 128, %s517_s5, [#allocation4]   ;;  %v367_v31 = vpop.f32.mrf.mxu1 }
 0x1cc   :  { %455 = dma.done.wait [#allocation4], 128  }
 0x1cd   :  { %456 = vsyncadd [#allocation4], 4294967168 }
 0x1ce   :  { %289 = vsyncpa [#allocation3], 1 }
 0x1cf   :  { %290 = vsyncpa [#allocation6], 1 }
 0x1d0   :  { %291 = vsyncpa [#allocation4], 1 }

// kernel: _forward_impl.1
= control target key start
LH: loop header
LB: loop body
LE: loop exit
PB: predicated region body
PF: predicated region fallthrough
CT: control target
= control target key end

     0   :  { %10 = vsyncpa [#allocation3], 0  ;;  %s512_s0 = inlined_call_operand.vmem [shape: bf16[8,128], index: 0, kind: input, shape index: {}]   ;;  %s513_s1 = inlined_call_operand.hbm [shape: bf16[128,128], index: 1, kind: input, shape index: {}]   ;;  %s514_s2 = inlined_call_operand.vmem [shape: f32[1,128], index: 2, kind: input, shape index: {}]   ;;  %s515_s3 = inlined_call_operand.hbm [shape: bf16[128,128], index: 3, kind: input, shape index: {}]   ;;  %s516_s4 = inlined_call_operand.vmem [shape: f32[1,128], index: 4, kind: input, shape index: {}]   ;;  %s517_s5 = inlined_call_operand.hbm [shape: f32[8,128], index: 5, kind: output, shape index: {}]  }
   0x1   :  { %11 = vsyncpa [#allocation6], 0 }
   0x2   :  { %12 = vsyncpa [#allocation4], 0  ;;  %s457_s18 = smov [#allocation2]  }
   0x3   :  { %s20_s19 = sshll.u32 %s457_s18, 4  ;;  %s21_s19 = int_to_ptr.vmem [resolvable:$true] %s20_s19 }
   0x4   :  { %s399_s20 = scalar_lea.vmem %s21_s19, 1024  ;;  %p404_p1 = scmp.lt.s32.totalorder %s21_s19, %s21_s19 }
   0x5   :  { %p400_p0 = scmp.ne.s32.totalorder %s21_s19, %s399_s20  ;;  %p405_p2 = scmp.lt.s32.totalorder %s399_s20, %s399_s20 }
   0x7   :  { %p406_p3 = por %p405_p2, %p404_p1 }
   0x9   :  { %p407_p4 = pnand %p406_p3, %p400_p0 }
   0xb   :  { %410 = shalt.err (!%p407_p4)
}
   0xc   :  { %s458_s21 = smov 64   ;;  %s459_s22 = smov 4  }
   0xd   :  { %26 = dma.hbm_to_vmem [thread:$0]  %s513_s1, 1024, %s21_s19, [#allocation3], %s458_s21, %s458_s21, %s459_s22  }
   0xe   :  { %s460_s25 = smov [#allocation5]  }
   0xf   :  { %s34_s26 = sshll.u32 %s460_s25, 4  ;;  %s35_s26 = int_to_ptr.vmem [resolvable:$true] %s34_s26 }
  0x10   :  { %s419_s27 = scalar_lea.vmem %s35_s26, 1024  ;;  %p424_p6 = scmp.lt.s32.totalorder %s35_s26, %s35_s26 }
  0x11   :  { %p420_p5 = scmp.ne.s32.totalorder %s35_s26, %s419_s27  ;;  %p425_p7 = scmp.lt.s32.totalorder %s419_s27, %s419_s27 }
  0x13   :  { %p426_p8 = por %p425_p7, %p424_p6 }
  0x15   :  { %p427_p9 = pnand %p426_p8, %p420_p5 }
  0x17   :  { %430 = shalt.err (!%p427_p9)
}
  0x18   :  { %40 = dma.hbm_to_vmem [thread:$0]  %s515_s3, 1024, %s35_s26, [#allocation6], %s458_s21, %s458_s21, %s459_s22  }
  0x19   :  { %451 = dma.done.wait [#allocation3], 1024  }
  0x1a   :  { %452 = vsyncadd [#allocation3], 4294966272 }
  0x1b   :  { %453 = dma.done.wait [#allocation6], 1024  }
  0x1c   :  { %454 = vsyncadd [#allocation6], 4294966272  ;;  %v461_v0 = vmov 0.0   ;;  %vm462_vm0 = vmmov 0   ;;  %v375_v1 = vld [vmem:[#allocation2 + $0x38] sm:$0xff]   ;;  %v376_v2 = vld [vmem:[#allocation2 + $0x30] sm:$0xff]  }
  0x1d   :  { %328 = vmatprep.subr.bf16.mxu0 %v461_v0  ;;  %344 = vmatprep.mubr.msk.bf16.mxu0 %vm462_vm0, %v461_v0  ;;  %v377_v3 = vld [vmem:[#allocation2 + $0x28] sm:$0xff]   ;;  %v383_v4 = vld [vmem:[#allocation5 + $0x38] sm:$0xff]   ;;  %v378_v5 = vld [vmem:[#allocation2 + $0x20] sm:$0xff]   ;;  %s463_s8 = smov [#allocation7]  }
  0x1e   :  { %348 = vmatprep.subr.bf16.mxu1 %v461_v0  ;;  %364 = vmatprep.mubr.msk.bf16.mxu1 %vm462_vm0, %v461_v0  ;;  %v384_v6 = vld [vmem:[#allocation5 + $0x30] sm:$0xff]   ;;  %v379_v7 = vld [vmem:[#allocation2 + $0x18] sm:$0xff]   ;;  %v385_v8 = vld [vmem:[#allocation5 + $0x28] sm:$0xff]   ;;  %s282_s9 = sshll.u32 %s463_s8, 4  ;;  %s283_s9 = int_to_ptr.vmem [resolvable:$true] %s282_s9 }
  0x1f   :  { %329 = vmatpush3.bf16.msra.mxu0 %v375_v1  ;;  %349 = vmatpush3.bf16.msra.mxu1 %v383_v4  ;;  %v380_v9 = vld [vmem:[#allocation2 + $0x10] sm:$0xff]   ;;  %v386_v10 = vld [vmem:[#allocation5 + $0x20] sm:$0xff]   ;;  %v381_v11 = vld [vmem:[#allocation2 + $0x8] sm:$0xff]   ;;  %p436_p11 = scmp.lt.s32.totalorder %s283_s9, %s283_s9 }
  0x20   :  { %330 = vmatprep.subr.bf16.mxu0 %v461_v0  ;;  %350 = vmatprep.subr.bf16.mxu1 %v461_v0  ;;  %v387_v12 = vld [vmem:[#allocation5 + $0x18] sm:$0xff]   ;;  %v382_v13 = vld [vmem:[#allocation2] sm:$0xff]   ;;  %v388_v14 = vld [vmem:[#allocation5 + $0x10] sm:$0xff]  }
  0x21   :  { %v50_v15 = vld [vmem:[%s512_s0] sm:$0xf]  ;;  %v389_v16 = vld [vmem:[#allocation5 + $0x8] sm:$0xff]  }
  0x22   :  { %v390_v17 = vld [vmem:[#allocation5] sm:$0xff]  }
  0x23   :  { %331 = vmatpush3.bf16.msra.mxu0 %v376_v2  ;;  %351 = vmatpush3.bf16.msra.mxu1 %v384_v6  ;;  %v292_v18 = vld [vmem:[%s514_s2] ss:$0 sm:$0xff]  ;;  %s431_s2 = scalar_lea.vmem %s283_s9, 128 }
  0x24   :  { %332 = vmatprep.subr.bf16.mxu0 %v461_v0  ;;  %352 = vmatprep.subr.bf16.mxu1 %v461_v0  ;;  %v301_v26 = vld [vmem:[%s516_s4] ss:$0 sm:$0xff]  ;;  %p432_p10 = scmp.ne.s32.totalorder %s283_s9, %s431_s2  ;;  %p437_p12 = scmp.lt.s32.totalorder %s431_s2, %s431_s2 }
  0x26   :  { %p438_p13 = por %p437_p12, %p436_p11 }
  0x27   :  { %333 = vmatpush3.bf16.msra.mxu0 %v377_v3  ;;  %353 = vmatpush3.bf16.msra.mxu1 %v385_v8 }
  0x28   :  { %334 = vmatprep.subr.bf16.mxu0 %v461_v0  ;;  %354 = vmatprep.subr.bf16.mxu1 %v461_v0  ;;  %p439_p0 = pnand %p438_p13, %p432_p10 }
  0x2b   :  { %335 = vmatpush3.bf16.msra.mxu0 %v378_v5  ;;  %355 = vmatpush3.bf16.msra.mxu1 %v386_v10 }
  0x2c   :  { %336 = vmatprep.subr.bf16.mxu0 %v461_v0  ;;  %356 = vmatprep.subr.bf16.mxu1 %v461_v0 }
  0x2f   :  { %337 = vmatpush3.bf16.msra.mxu0 %v379_v7  ;;  %357 = vmatpush3.bf16.msra.mxu1 %v387_v12 }
  0x30   :  { %338 = vmatprep.subr.bf16.mxu0 %v461_v0  ;;  %358 = vmatprep.subr.bf16.mxu1 %v461_v0 }
  0x33   :  { %339 = vmatpush3.bf16.msra.mxu0 %v380_v9  ;;  %359 = vmatpush3.bf16.msra.mxu1 %v388_v14 }
  0x34   :  { %340 = vmatprep.subr.bf16.mxu0 %v461_v0  ;;  %360 = vmatprep.subr.bf16.mxu1 %v461_v0 }
  0x37   :  { %341 = vmatpush3.bf16.msra.mxu0 %v381_v11  ;;  %361 = vmatpush3.bf16.msra.mxu1 %v389_v16 }
  0x38   :  { %342 = vmatprep.subr.bf16.mxu0 %v461_v0  ;;  %362 = vmatprep.subr.bf16.mxu1 %v461_v0 }
  0x3b   :  { %343 = vmatpush3.bf16.msra.mxu0 %v382_v13  ;;  %363 = vmatpush3.bf16.msra.mxu1 %v390_v17 }
  0x3e   :  { %345 = vmatmul.mubr.bf16.vlgmr.msra.gmra.mxu0 %v50_v15 }
  0xfe   :  { %v156_v19 = vpop.f32.mrf.mxu0 }
  0xff   :  { %v157_v20 = vadd.f32 %v292_v18, %v156_v19 }
 0x100   :  { %v346_v21 = vpop.f32.mrf.mxu0 }
 0x101   :  { %v162_v22 = vmax.f32 %v157_v20, 0.0 }
 0x102   :  { %v159_v23 = vpop.f32.mrf.mxu0 }
 0x103   :  { %v163_v24 = vpack.c.bf16 %v162_v22, %v162_v22 }
 0x104   :  { %v347_v25 = vpop.f32.mrf.mxu0 }
 0x105   :  { %365 = vmatmul.mubr.bf16.vlgmr.msra.gmra.mxu1 %v163_v24 }
 0x1c5   :  { %v269_v27 = vpop.f32.mrf.mxu1 }
 0x1c6   :  { %v270_v28 = vadd.f32 %v301_v26, %v269_v27 }
 0x1c7   :  { %v366_v29 = vpop.f32.mrf.mxu1 }
 0x1c8   :  { %275 = vst [vmem:[#allocation7] sm:$0xff] %v270_v28 }
 0x1c9   :  { %v272_v30 = vpop.f32.mrf.mxu1 }
 0x1ca   :  { %442 = shalt.err (!%p439_p0)
}
 0x1cb   :  { %285 = dma.vmem_to_hbm [thread:$0]  %s283_s9, 128, %s517_s5, [#allocation4]   ;;  %v367_v31 = vpop.f32.mrf.mxu1 }
 0x1cc   :  { %455 = dma.done.wait [#allocation4], 128  }
 0x1cd   :  { %456 = vsyncadd [#allocation4], 4294967168 }
 0x1ce   :  { %289 = vsyncpa [#allocation3], 1 }
 0x1cf   :  { %290 = vsyncpa [#allocation6], 1 }
 0x1d0   :  { %291 = vsyncpa [#allocation4], 1 }

</bundles_post_ra>
